<compile_context>
chip_gen: v6e
topology: v6e:2x2x1
jax: 0.10.0
libtpu: 0.0.40
codegen_flags: <defaults>
</compile_context>

<pallas_src>
import jax
import jax.numpy as jnp
from jax.experimental import pallas as pl
from jax.experimental.pallas import tpu as pltpu


def _round_up(n, m):
    return ((n + m - 1) // m) * m


def rerank_kernel(w_ref, b_ref, x_ref, o_ref):
    # w_ref: (5, 15)   resident weight
    # b_ref: (5, 1)    resident bias (lane-broadcast)
    # x_ref: (tb, 15)  streamed input tile, natural layout (contiguous HBM rows)
    # o_ref: (5, tb)   streamed output tile, batch on lanes (dense stores)
    y = jax.lax.dot_general(
        w_ref[...], x_ref[...],
        dimension_numbers=(((1,), (1,)), ((), ())),   # W @ x^T on the MXU
        preferred_element_type=jnp.float32,
    )
    o_ref[...] = jax.nn.sigmoid(y + b_ref[...])       # sigmoid -> EUP slot


def rerank_forward(x, weight, bias, *, tb=8192):
    """x: (B, 15), weight: (5, 15) (torch layout), bias: (5,).

    Returns sigmoid(x @ weight.T + bias) as float32, shape (B, 5).
    """
    B, in_f = x.shape
    out_f = weight.shape[0]

    # Batch tile: force a multiple of 128 (lane width / sublane rule).
    tb = max(128, _round_up(int(tb), 128))
    # Never stream past one rounded-up batch worth of rows.
    tb = min(tb, _round_up(B, 128))
    # Keep >= 2 grid tiles when the batch allows it so ("parallel",) can shard
    # tiles across both TensorCores on v7x (no effect on v5e/v6e).
    if B > 128 and pl.cdiv(B, tb) < 2:
        tb = max(128, _round_up((B + 1) // 2, 128))
    n_tiles = pl.cdiv(B, tb)   # partial last tile handled by Pallas masking

    out_t = pl.pallas_call(
        rerank_kernel,
        out_shape=jax.ShapeDtypeStruct((out_f, B), jnp.float32),
        grid=(n_tiles,),
        in_specs=[
            pl.BlockSpec((out_f, in_f), lambda i: (0, 0)),  # W: VMEM-resident
            pl.BlockSpec((out_f, 1), lambda i: (0, 0)),     # b: VMEM-resident
            pl.BlockSpec((tb, in_f), lambda i: (i, 0)),     # x tile: streamed
        ],
        out_specs=pl.BlockSpec((out_f, tb), lambda i: (0, i)),
        compiler_params=pltpu.CompilerParams(
            dimension_semantics=("parallel",),          # megacore on v7x
            vmem_limit_bytes=32 * 1024 * 1024,          # safe headroom on v5e/v7x
        ),
    )(
        weight.astype(jnp.float32),
        bias.astype(jnp.float32).reshape(out_f, 1),
        x.astype(jnp.float32),
    )

    # Cheap layout fixup (20*B bytes) back to the PyTorch (B, 5) convention.
    return out_t.T


if __name__ == "__main__":
    key = jax.random.PRNGKey(0)
    k_x, k_w, k_b, k_x2 = jax.random.split(key, 4)

    n_best = 5            # matches RerankLayer(n_best) (unused in forward math)
    in_features = 15
    out_features = 5
    batch = 300           # not a multiple of 128 -> exercises partial-tile masking

    # Deterministic synthetic parameters (mimic nn.Linear init ranges).
    bound = 1.0 / (in_features ** 0.5)
    weight = jax.random.uniform(
        k_w, (out_features, in_features), jnp.float32, -bound, bound)
    bias = jax.random.uniform(
        k_b, (out_features,), jnp.float32, -bound, bound)

    x = jax.random.normal(k_x, (batch, in_features), jnp.float32)

    out = rerank_forward(x, weight, bias)          # default tb, clamps to 2 tiles
    out = jax.block_until_ready(out)

    ref = jax.nn.sigmoid(x @ weight.T + bias)
    assert out.shape == (batch, out_features)
    assert out.dtype == jnp.float32
    assert jnp.allclose(out, ref, atol=1e-5, rtol=1e-5)

    # Tiny-batch sanity check (single partial tile).
    x2 = jax.random.normal(k_x2, (4, in_features), jnp.float32)
    out2 = jax.block_until_ready(rerank_forward(x2, weight, bias))
    ref2 = jax.nn.sigmoid(x2 @ weight.T + bias)
    assert out2.shape == (4, out_features)
    assert jnp.allclose(out2, ref2, atol=1e-5, rtol=1e-5)

    print("KERNEL_OK")
</pallas_src>

<mosaic_0001>
module attributes {stable_mosaic.version = 11 : i64} {
  func.func @rerank_kernel(%arg0: i32, %arg1: memref<5x15xf32, #tpu.memory_space<vmem>>, %arg2: memref<5x1xf32, #tpu.memory_space<vmem>>, %arg3: memref<256x15xf32, #tpu.memory_space<vmem>>, %arg4: memref<5x256xf32, #tpu.memory_space<vmem>>) attributes {dimension_semantics = [#tpu.dimension_semantics<parallel>], iteration_bounds = array<i64: 2>, scalar_prefetch = 0 : i64, scratch_operands = 0 : i64, tpu.core_type = #tpu.core_type<tc>, window_params = [{pipeline_mode = #tpu.pipeline_mode<synchronous>, transform_indices = @transform_0, window_bounds = array<i64: 5, 15>}, {pipeline_mode = #tpu.pipeline_mode<synchronous>, transform_indices = @transform_1, window_bounds = array<i64: 5, 1>}, {transform_indices = @transform_2, window_bounds = array<i64: 256, 15>}, {transform_indices = @transform_3, window_bounds = array<i64: 5, 256>}]} {
    %c0 = arith.constant 0 : index
    %c0_0 = arith.constant 0 : index
    %0 = vector.load %arg1[%c0, %c0_0] : memref<5x15xf32, #tpu.memory_space<vmem>>, vector<5x15xf32>
    %c0_1 = arith.constant 0 : index
    %c0_2 = arith.constant 0 : index
    %1 = vector.load %arg3[%c0_1, %c0_2] : memref<256x15xf32, #tpu.memory_space<vmem>>, vector<256x15xf32>
    %cst = arith.constant dense<0.000000e+00> : vector<5x256xf32>
    %2 = tpu.matmul %0, %1, %cst {dimension_numbers = #tpu.dot_dimension_numbers<[1], [1], [0], [0], [0, 0, 1, 0], [], []>} : vector<5x15xf32>, vector<256x15xf32>, vector<5x256xf32> -> vector<5x256xf32>
    %c0_3 = arith.constant 0 : index
    %c0_4 = arith.constant 0 : index
    %3 = vector.load %arg2[%c0_3, %c0_4] : memref<5x1xf32, #tpu.memory_space<vmem>>, vector<5x1xf32>
    %4 = vector.broadcast %3 : vector<5x1xf32> to vector<5x256xf32>
    %5 = arith.addf %2, %4 : vector<5x256xf32>
    %6 = arith.negf %5 : vector<5x256xf32>
    %7 = math.exp %6 : vector<5x256xf32>
    %cst_5 = arith.constant 1.000000e+00 : f32
    %8 = vector.broadcast %cst_5 : f32 to vector<5x256xf32>
    %9 = arith.addf %8, %7 : vector<5x256xf32>
    %10 = arith.divf %8, %9 : vector<5x256xf32>
    %c0_6 = arith.constant 0 : index
    %c0_7 = arith.constant 0 : index
    %11 = vector.load %arg4[%c0_6, %c0_7] : memref<5x256xf32, #tpu.memory_space<vmem>>, vector<5x256xf32>
    tpu.vector_store %arg4[%c0_6, %c0_7], %10 {strides = array<i32>} : memref<5x256xf32, #tpu.memory_space<vmem>>, vector<5x256xf32>,
    return
  }
  func.func @transform_0(%arg0: i32) -> (i32, i32) {
    %c0_i32 = arith.constant 0 : i32
    %c0_i32_0 = arith.constant 0 : i32
    %c0_i32_1 = arith.constant 0 : i32
    return %c0_i32, %c0_i32_0 : i32, i32
  }
  func.func @transform_1(%arg0: i32) -> (i32, i32) {
    %c0_i32 = arith.constant 0 : i32
    %c0_i32_0 = arith.constant 0 : i32
    %c0_i32_1 = arith.constant 0 : i32
    return %c0_i32, %c0_i32_0 : i32, i32
  }
  func.func @transform_2(%arg0: i32) -> (i32, i32) {
    %c0_i32 = arith.constant 0 : i32
    %c0_i32_0 = arith.constant 0 : i32
    return %arg0, %c0_i32 : i32, i32
  }
  func.func @transform_3(%arg0: i32) -> (i32, i32) {
    %c0_i32 = arith.constant 0 : i32
    %c0_i32_0 = arith.constant 0 : i32
    return %c0_i32, %arg0 : i32, i32
  }
}

</mosaic_0001>

<bundles_post_ra>
// kernel: tpu_custom_call.1
= control target key start
LH: loop header
LB: loop body
LE: loop exit
PB: predicated region body
PF: predicated region fallthrough
CT: control target
= control target key end

     0   :  { %8 = vsyncpa [#allocation3], 0  ;;  %s896_s0 = inlined_call_operand.vmem [shape: f32[5,15], index: 0, kind: input, shape index: {}]   ;;  %s897_s1 = inlined_call_operand.vmem [shape: f32[5,1], index: 1, kind: input, shape index: {}]   ;;  %s898_s2 = inlined_call_operand.vmem [shape: f32[300,15], index: 2, kind: input, shape index: {}]   ;;  %s899_s3 = inlined_call_operand.hbm [shape: f32[5,300], index: 3, kind: output, shape index: {}]  }
   0x1   :  { %10 = vsyncpa [#allocation3 + $0x1], 0  ;;  %s718_s12 = smov 0   ;;  %s720_s13 = smov 0  }
   0x2   :  { %s722_s14 = smov 0   ;;  %s724_s15 = smov 0  }
   0x3 LB: > { %s739_s16 = sadd.s32 4294967295, %s694_s15   ;;  %s500_s17 = sadd.s32 4294967294, %s694_s15   ;;  %s694_s15 = sphi %s724_s15, %s905_s15   ;;  %s690_s14 = sphi %s722_s14, %s904_s14   ;;  %s686_s13 = sphi %s720_s13, %s903_s13   ;;  %s682_s12 = sphi %s718_s12, %s902_s12  }
   0x4   : > { %s743_s18 = sadd.s32 1, %s694_s15   ;;  %s91_s19 = sadd.s32 1, %s690_s14 }
   0x5   : > { %s88_s20 = ssub.s32 %s694_s15, %s743_s18  ;;  %p101_p0 = scmp.ne.s32.totalorder %s690_s14, %s686_s13 }
   0x6   : > { %p89_p1 = scmp.eq.s32.totalorder %s88_s20, 0  ;;  %p102_p2 = scmp.eq.s32.totalorder %s739_s16, 1 }
   0x7   : > { %p107_p3 = scmp.ne.s32.totalorder %s686_s13, %s682_s12  ;;  %p108_p4 = scmp.eq.s32.totalorder %s500_s17, 1 }
   0x8   : > { %s754_s21 = scalar_select %p89_p1, %s690_s14, %s91_s19  }
   0x9   : > { %p756_p5 = por %p102_p2, %p101_p0  ;;  %p760_p6 = por %p108_p4, %p107_p3 }
   0xa   : > { %p503_p7 = scmp.ge.s32.totalorder %s694_s15, 1  ;;  %p149_p8 = scmp.lt.s32.totalorder %s694_s15, 3 }
   0xc   : > { %p150_p9 = pnand %p503_p7, %p149_p8 }
   0xd   : > { %s505_s24 = sshll.u32 (!%p150_p9), %s739_s16, 5  ;;  %s174_s6 = sand.u32 (!%p150_p9), 1, %s686_s13  }
   0xe   : > { %153 = sbr.rel (%p150_p9) target bundleno = 343 (0x157), region = 32  ;;  %p182_p10 = scmp.lt.s32.totalorder (!%p150_p9), %s505_s24, 37 }
   0xf   : > { %s504_s7 = sshll.u32 (!%p150_p9), %s174_s6, 4  ;;  %s849_s9 = scalar_lea.sflag (!%p150_p9), [#allocation3], %s174_s6 }
  0x10   : > { %s176_s8 = scalar_lea.vmem (!%p150_p9), [#allocation2], %s504_s7 }
  0x13   : > { %vm235_vm0 = vcmask 121856   ;;  %v770_v0 = vld [vmem:[%s896_s0] sm:$0x1f]  ;;  %v696_v1 = vmov 0   ;;  %s907_s24 = smov (!%p182_p10, %s505_s24), 37  ;;  %s543_s10 = sshll.u32 (%p756_p5), %s739_s16, 1 }
  0x14   : > { %584 = vmatprep.mubr.msk.f32.mxu0 %vm235_vm0, %v770_v0  ;;  %625 = vset.pattern.permute.xlu0 %v696_v1  ;;  %v229_v2 = vld [vmem:[%s897_s1] sm:$0x1f]  ;;  %s506_s29 = sshll.u32 %s907_s24, 3  ;;  %s429_s11 = ssub.s32 (%p756_p5), 3, %s543_s10 }
  0x15   : > { %232 = vperm.xlu0 %625, %v229_v2   ;;  %s780_s5 = scalar_lea.vmem %s898_s2, %s506_s29  ;;  %p430_p11 = scmp.lt.s32.totalorder (%p756_p5), %s429_s11, 2 }
  0x16   : > { %v228_v3 = vld [vmem:[%s780_s5 + $0xf8] sm:$0xff]  ;;  %v227_v5 = vld [vmem:[%s780_s5 + $0xf0] sm:$0xff]  ;;  %v226_v7 = vld [vmem:[%s780_s5 + $0xe8] sm:$0xff] }
  0x17   : > { %v212_v4 = vld [vmem:[%s780_s5 + $0x78] sm:$0xff]  ;;  %552 = vmatprep.subr.msk.mxu0 %vm235_vm0, %v228_v3  ;;  %v211_v6 = vld [vmem:[%s780_s5 + $0x70] sm:$0xff]  ;;  %v210_v8 = vld [vmem:[%s780_s5 + $0x68] sm:$0xff] }
  0x18   : > { %553 = vmatpush3.xpose.msk.msra.mxu0 %vm235_vm0, %v212_v4  ;;  %v225_v9 = vld [vmem:[%s780_s5 + $0xe0] sm:$0xff]  ;;  %v224_v11 = vld [vmem:[%s780_s5 + $0xd8] sm:$0xff]  ;;  %v223_v13 = vld [vmem:[%s780_s5 + $0xd0] sm:$0xff] }
  0x19   : > { %554 = vmatprep.subr.msk.mxu0 %vm235_vm0, %v227_v5  ;;  %v209_v10 = vld [vmem:[%s780_s5 + $0x60] sm:$0xff]  ;;  %v208_v12 = vld [vmem:[%s780_s5 + $0x58] sm:$0xff]  ;;  %v207_v14 = vld [vmem:[%s780_s5 + $0x50] sm:$0xff] }
  0x1a   : > { %v222_v15 = vld [vmem:[%s780_s5 + $0xc8] sm:$0xff]  ;;  %v221_v17 = vld [vmem:[%s780_s5 + $0xc0] sm:$0xff]  ;;  %v220_v19 = vld [vmem:[%s780_s5 + $0xb8] sm:$0xff] }
  0x1b   : > { %v206_v16 = vld [vmem:[%s780_s5 + $0x48] sm:$0xff]  ;;  %v205_v18 = vld [vmem:[%s780_s5 + $0x40] sm:$0xff]  ;;  %v204_v20 = vld [vmem:[%s780_s5 + $0x38] sm:$0xff] }
  0x1c   : > { %555 = vmatpush3.xpose.msk.msra.mxu0 %vm235_vm0, %v211_v6  ;;  %v219_v21 = vld [vmem:[%s780_s5 + $0xb0] sm:$0xff]  ;;  %v218_v23 = vld [vmem:[%s780_s5 + $0xa8] sm:$0xff]  ;;  %v217_v25 = vld [vmem:[%s780_s5 + $0xa0] sm:$0xff] }
  0x1d   : > { %556 = vmatprep.subr.msk.mxu0 %vm235_vm0, %v226_v7  ;;  %v203_v22 = vld [vmem:[%s780_s5 + $0x30] sm:$0xff]  ;;  %v202_v24 = vld [vmem:[%s780_s5 + $0x28] sm:$0xff]  ;;  %v201_v26 = vld [vmem:[%s780_s5 + $0x20] sm:$0xff] }
  0x1e   : > { %v216_v27 = vld [vmem:[%s780_s5 + $0x98] sm:$0xff]  ;;  %v215_v29 = vld [vmem:[%s780_s5 + $0x90] sm:$0xff]  ;;  %v214_v31 = vld [vmem:[%s780_s5 + $0x88] sm:$0xff] }
  0x1f   : > { %v200_v28 = vld [vmem:[%s780_s5 + $0x18] sm:$0xff]  ;;  %v199_v30 = vld [vmem:[%s780_s5 + $0x10] sm:$0xff]  ;;  %v198_v32 = vld [vmem:[%s780_s5 + $0x8] sm:$0xff] }
  0x20   : > { %557 = vmatpush3.xpose.msk.msra.mxu0 %vm235_vm0, %v210_v8  ;;  %v213_v33 = vld [vmem:[%s780_s5 + $0x80] sm:$0xff] }
  0x21   : > { %558 = vmatprep.subr.msk.mxu0 %vm235_vm0, %v225_v9  ;;  %v197_v34 = vld [vmem:[%s780_s5] sm:$0xff] }
  0x24   : > { %559 = vmatpush3.xpose.msk.msra.mxu0 %vm235_vm0, %v209_v10 }
  0x25   : > { %560 = vmatprep.subr.msk.mxu0 %vm235_vm0, %v224_v11 }
  0x28   : > { %561 = vmatpush3.xpose.msk.msra.mxu0 %vm235_vm0, %v208_v12 }
  0x29   : > { %562 = vmatprep.subr.msk.mxu0 %vm235_vm0, %v223_v13 }
  0x2c   : > { %563 = vmatpush3.xpose.msk.msra.mxu0 %vm235_vm0, %v207_v14 }
  0x2d   : > { %564 = vmatprep.subr.msk.mxu0 %vm235_vm0, %v222_v15 }
  0x30   : > { %565 = vmatpush3.xpose.msk.msra.mxu0 %vm235_vm0, %v206_v16 }
  0x31   : > { %566 = vmatprep.subr.msk.mxu0 %vm235_vm0, %v221_v17 }
  0x34   : > { %567 = vmatpush3.xpose.msk.msra.mxu0 %vm235_vm0, %v205_v18 }
  0x35   : > { %568 = vmatprep.subr.msk.mxu0 %vm235_vm0, %v220_v19 }
  0x38   : > { %569 = vmatpush3.xpose.msk.msra.mxu0 %vm235_vm0, %v204_v20 }
  0x39   : > { %570 = vmatprep.subr.msk.mxu0 %vm235_vm0, %v219_v21 }
  0x3c   : > { %571 = vmatpush3.xpose.msk.msra.mxu0 %vm235_vm0, %v203_v22 }
  0x3d   : > { %572 = vmatprep.subr.msk.mxu0 %vm235_vm0, %v218_v23 }
  0x40   : > { %573 = vmatpush3.xpose.msk.msra.mxu0 %vm235_vm0, %v202_v24 }
  0x41   : > { %574 = vmatprep.subr.msk.mxu0 %vm235_vm0, %v217_v25 }
  0x44   : > { %575 = vmatpush3.xpose.msk.msra.mxu0 %vm235_vm0, %v201_v26 }
  0x45   : > { %576 = vmatprep.subr.msk.mxu0 %vm235_vm0, %v216_v27 }
  0x48   : > { %577 = vmatpush3.xpose.msk.msra.mxu0 %vm235_vm0, %v200_v28 }
  0x49   : > { %578 = vmatprep.subr.msk.mxu0 %vm235_vm0, %v215_v29 }
  0x4c   : > { %579 = vmatpush3.xpose.msk.msra.mxu0 %vm235_vm0, %v199_v30 }
  0x4d   : > { %580 = vmatprep.subr.msk.mxu0 %vm235_vm0, %v214_v31 }
  0x50   : > { %581 = vmatpush3.xpose.msk.msra.mxu0 %vm235_vm0, %v198_v32 }
  0x51   : > { %582 = vmatprep.subr.msk.mxu0 %vm235_vm0, %v213_v33 }
  0x54   : > { %583 = vmatpush3.xpose.msk.msra.mxu0 %vm235_vm0, %v197_v34 }
  0x57   : > { %585 = vmatmul.mubr.msk.f32.vlgmr.msra.gmra.mxu0 %vm235_vm0, %v770_v0 }
  0x90   : > { %v233_v35 = vpop.permute.xlu0 %232 }
 0x117   : > { %v401_v36 = vpop.f32.mrf.mxu0 }
 0x118   : > { %v402_v37 = vadd.f32 %v401_v36, %v233_v35 }
 0x119   : > { %v403_v38 = vpop.f32.mrf.mxu0 }
 0x11a   : > { %v540_v39 = vmul.f32 -1.442695, %v402_v37  ;;  %v404_v40 = vadd.f32 %v403_v38, %v233_v35 }
 0x11c   : > { %626 = vpow2.f32 %v540_v39  ;;  %v541_v41 = vmul.f32 -1.442695, %v404_v40 }
 0x11e   : > { %628 = vpow2.f32 %v541_v41 }
 0x129   : > { %v627_v42 = vpop.eup %626 }
 0x12a   : > { %v412_v43 = vadd.f32 1.0, %v627_v42 }
 0x12b   : > { %v629_v44 = vpop.eup %628 }
 0x12c   : > { %630 = vrcp.f32 %v412_v43  ;;  %v413_v45 = vadd.f32 1.0, %v629_v44 }
 0x12e   : > { %632 = vrcp.f32 %v413_v45 }
 0x138   : > { %427 = sbr.rel (!%p756_p5) target bundleno = 343 (0x157), region = 36 }
 0x139   : > { %v631_v46 = vpop.eup %630 }
 0x13a   : > { %418 = vst [vmem:[%s176_s8] sm:$0x1f] %v631_v46 }
 0x13b   : > { %v633_v47 = vpop.eup %632 }
 0x13c   : > { %419 = vst [vmem:[%s176_s8 + $0x8] sm:$0x1f] %v633_v47 }
 0x13d   : > { %s909_s11 = smov (!%p430_p11, %s429_s11), 2 }
 0x13e   : > { %s854_s17 = sshll.u32 %s909_s11, 7 }
 0x13f   : > { %s434_s19 = ssub.s32 256, %s854_s17 }
 0x140   : > { %435 = vsyncadd %s849_s9, %s434_s19  ;;  %p545_p12 = scmp.ne.s32.totalorder %s854_s17, 0  ;;  %s551_s20 = sshll.u32 %s739_s16, 8 }
 0x141   : > { %s438_s25 = scalar_lea.hbm %s899_s3, %s551_s20  ;;  %s441_s26 = sshll.u32 %s176_s8, 4  ;;  %s442_s26 = int_to_ptr.vmem [resolvable:$true] %s441_s26 }
 0x142   : > { %s634_s27 = scalar_lea.vmem %s442_s26, %s854_s17  ;;  %s697_s28 = smov [#allocation2]  }
 0x143   : > { %p635_p13 = scmp.ne.s32.totalorder %s442_s26, %s634_s27  ;;  %s638_s29 = sshll.u32 %s697_s28, 4  ;;  %s639_s29 = int_to_ptr.vmem [resolvable:$false] %s638_s29 }
 0x144   : > { %s640_s30 = scalar_lea.vmem %s639_s29, 512  ;;  %p641_p2 = scmp.lt.s32.totalorder %s442_s26, %s639_s29 }
 0x145   : > { %p636_p0 = pnand %p635_p13, %p545_p12  ;;  %p642_p3 = scmp.lt.s32.totalorder %s640_s30, %s634_s27 }
 0x147   : > { %p637_p1 = pneg %p636_p0  ;;  %p643_p4 = por %p642_p3, %p641_p2 }
 0x149   : > { %p644_p5 = pnand %p643_p4, %p637_p1 }
 0x14b   : > { %647 = shalt.err (!%p644_p5)
}
 0x14c   : > { %s648_s16 = scalar_lea.hbm %s438_s25, %s854_s17  ;;  %s652_s6 = scalar_lea.hbm %s899_s3, 384 }
 0x14d   : > { %p649_p7 = scmp.ne.s32.totalorder %s438_s25, %s648_s16  ;;  %p653_p10 = scmp.lt.s32.totalorder %s438_s25, %s899_s3 }
 0x14e   : > { %p654_p11 = scmp.lt.s32.totalorder %s652_s6, %s648_s16 }
 0x14f   : > { %p650_p8 = pnand %p649_p7, %p545_p12 }
 0x150   : > { %p655_p13 = por %p654_p11, %p653_p10 }
 0x151   : > { %p651_p9 = pneg %p650_p8 }
 0x153   : > { %p656_p0 = pnand %p655_p13, %p651_p9 }
 0x155   : > { %659 = shalt.err (!%p656_p0)
}
 0x156   : > { %444 = dma.vmem_to_hbm [thread:$0]  (%p545_p12), %s442_s26, %s854_s17, %s438_s25, %s849_s9  }
 0x157 PF: > { %p591_p1 = scmp.ge.s32.totalorder %s694_s15, 2  ;;  %s453_s10 = sand.u32 1, %s682_s12  }
 0x158   : > { %s454_s11 = scalar_lea.sflag [#allocation3], %s453_s10 }
 0x159   : > { %p588_p2 = pnand %p591_p1, %p760_p6 }
 0x15b   : > { %p589_p3 = pneg %p588_p2 }
 0x15d   : > { %677 = dma.done.wait (%p589_p3), %s454_s11, 256  }
 0x15e   : > { %679 = vsyncadd (%p589_p3), %s454_s11, 4294967040  ;;  %p13_p4 = scmp.ge.s32.totalorder %s743_s18, 4   ;;  %s902_s12 = smov %s686_s13 }
 0x15f   : > { %s903_s13 = smov %s690_s14  ;;  %s904_s14 = smov %s754_s21 }
 0x160   : > { %s905_s15 = smov %s743_s18  ;;  %15 = sbr.rel (!%p13_p4) target bundleno = 3 (0x3), region = 67 }
 0x165   :  { %459 = vsyncpa [#allocation3], 1 }
 0x166   :  { %461 = vsyncpa [#allocation3 + $0x1], 1 }

</bundles_post_ra>
